<compile_context>
chip_gen: v6e
topology: v6e:2x2x1
jax: 0.10.0
libtpu: 0.0.40
codegen_flags: <defaults>
</compile_context>

<pallas_src>
import functools

import jax
import jax.numpy as jnp
from jax.experimental import pallas as pl
from jax.experimental.pallas import tpu as pltpu

BN_EPS = 1e-5


def _detect_vmem_budget():
    """(per-step tile budget, scoped-vmem limit) gated on the chip generation."""
    cap = None
    try:
        info = pltpu.get_tpu_info()
        cap = getattr(info, "vmem_capacity_bytes", None)
    except Exception:
        cap = None
    if cap is None:
        cap = 64 * 1024 * 1024                       # conservative default (v7x: 64 MiB/TC)
    if cap >= 96 * 1024 * 1024:                      # v5e / v6e: 128 MiB physical VMEM
        return 24 * 1024 * 1024, 64 * 1024 * 1024
    return 12 * 1024 * 1024, 32 * 1024 * 1024


_TILE_BUDGET, _VMEM_LIMIT = _detect_vmem_budget()


def _round_up(x, m):
    return (x + m - 1) // m * m


def _largest_tile(hw_padded, cap_cols):
    """Largest multiple of 128 <= cap_cols dividing hw_padded (hw_padded % 128 == 0)."""
    start = max(128, (min(cap_cols, hw_padded) // 128) * 128)
    for cand in range(start, 127, -128):
        if hw_padded % cand == 0:
            return cand
    return 128


def _choose_tiles(hw, cin, cout, in_bytes):
    """Per-pass spatial tiles and padded HW extent.

    Pass 1 per-column footprint: double-buffered x block + (Cout, thw) f32 intermediate.
    Pass 2 additionally carries the double-buffered f32 output block.
    The double-buffered weight block is part of the fixed footprint.
    """
    # TODO(synk): tile Cout (extra grid axis, (TCout, Cin) weight blocks) when
    # 2*Cout*Cin*in_bytes alone approaches the tile budget (huge channel counts on v7x).
    fixed = 2 * cout * cin * in_bytes + 64 * 1024
    per_col1 = 2 * cin * in_bytes + 2 * cout * 4
    per_col2 = 2 * cin * in_bytes + 3 * cout * 4
    avail = max(_TILE_BUDGET - fixed, 128 * per_col2)
    cap1 = max(128, (avail // per_col1) // 128 * 128)
    cap2 = max(128, (avail // per_col2) // 128 * 128)
    if hw <= cap2:
        return hw, hw, hw                             # single full-extent block, no padding
    hw_p = _round_up(hw, 128)
    return _largest_tile(hw_p, cap1), _largest_tile(hw_p, cap2), hw_p


def _stats_kernel(x_ref, w_ref, sum_ref, sumsq_ref):
    # x_ref: (Cin, THW1)  one spatial tile of one batch element (compute dtype)
    # w_ref: (Cout, Cin)  conv weight (compute dtype)
    # sum_ref / sumsq_ref: (Cout, 1) f32 per-batch partial accumulators, resident across
    #                      the spatial (reduction) grid axis.
    @pl.when(pl.program_id(1) == 0)
    def _init():
        sum_ref[...] = jnp.zeros_like(sum_ref)
        sumsq_ref[...] = jnp.zeros_like(sumsq_ref)

    z = jnp.dot(w_ref[...], x_ref[...], preferred_element_type=jnp.float32)
    sum_ref[...] += jnp.sum(z, axis=1, keepdims=True)
    sumsq_ref[...] += jnp.sum(z * z, axis=1, keepdims=True)


def _apply_kernel(x_ref, w_ref, b_ref, o_ref):
    # Fused conv + folded-BN affine + ReLU:  out = relu(W_eff @ x + b_eff)  (f32 output).
    y = jnp.dot(w_ref[...], x_ref[...], preferred_element_type=jnp.float32) + b_ref[...]
    o_ref[...] = jnp.maximum(y, 0.0).astype(o_ref.dtype)


@functools.partial(jax.jit, static_argnames=("compute_dtype",))
def cna1x1(x_nchw, conv_w, conv_b, bn_gamma, bn_beta, compute_dtype=jnp.bfloat16):
    """Forward pass of CNA1x1 (1x1 conv -> training-mode BatchNorm2d -> ReLU).

    x_nchw: (N, Cin, H, W) float32
    conv_w: (Cout, Cin)    float32   (1x1 conv weight with the trailing 1x1 squeezed)
    conv_b, bn_gamma, bn_beta: (Cout,) float32
    compute_dtype: dtype of the x/W streams fed to the MXU (bf16 default; f32 available).
    returns: (N, Cout, H, W) float32
    """
    n, cin, h, w = x_nchw.shape
    cout = conv_w.shape[0]
    hw = h * w
    in_bytes = jnp.dtype(compute_dtype).itemsize
    thw1, thw2, hw_p = _choose_tiles(hw, cin, cout, in_bytes)

    x3d = x_nchw.reshape(n, cin, hw).astype(compute_dtype)   # contiguous reshape, no transpose
    if hw_p != hw:
        x3d = jnp.pad(x3d, ((0, 0), (0, 0), (0, hw_p - hw)))  # zero cols contribute 0 to stats

    w_cd = conv_w.astype(compute_dtype)                       # (Cout, Cin)
    b2d = conv_b.reshape(cout, 1).astype(jnp.float32)

    w_spec = pl.BlockSpec((cout, cin), lambda i, j: (0, 0))
    acc_spec = pl.BlockSpec((None, cout, 1), lambda i, j: (i, 0, 0))

    # ---- Pass 1: stream x, accumulate per-batch per-channel sum(z), sum(z^2). ----------
    sums, sumsqs = pl.pallas_call(
        _stats_kernel,
        grid=(n, hw_p // thw1),
        in_specs=[pl.BlockSpec((None, cin, thw1), lambda i, j: (i, 0, j)), w_spec],
        out_specs=(acc_spec, acc_spec),
        out_shape=(jax.ShapeDtypeStruct((n, cout, 1), jnp.float32),
                   jax.ShapeDtypeStruct((n, cout, 1), jnp.float32)),
        compiler_params=pltpu.CompilerParams(
            dimension_semantics=("parallel", "arbitrary"),
            vmem_limit_bytes=_VMEM_LIMIT),
    )(x3d, w_cd)

    # ---- Tiny per-channel fold: BN (batch stats) into effective conv weights. ----------
    m_total = jnp.float32(n * hw)                 # true element count (padding contributes 0)
    sum_z = jnp.sum(sums, axis=0)                 # (Cout, 1)  reduce per-batch partials
    sumsq_z = jnp.sum(sumsqs, axis=0)
    mean_z = sum_z / m_total
    var = jnp.maximum(sumsq_z / m_total - mean_z * mean_z, 0.0)   # biased batch variance
    mean_y = mean_z + b2d                         # bias shifts the mean, not the variance
    scale = bn_gamma.reshape(cout, 1).astype(jnp.float32) * jax.lax.rsqrt(var + BN_EPS)
    w_eff = (scale * conv_w.astype(jnp.float32)).astype(compute_dtype)
    b_eff = scale * (b2d - mean_y) + bn_beta.reshape(cout, 1).astype(jnp.float32)

    # ---- Pass 2: fused conv + BN + ReLU, lane-dense stores, fully parallel grid. --------
    out3d = pl.pallas_call(
        _apply_kernel,
        grid=(n, hw_p // thw2),
        in_specs=[pl.BlockSpec((None, cin, thw2), lambda i, j: (i, 0, j)),
                  w_spec,
                  pl.BlockSpec((cout, 1), lambda i, j: (0, 0))],
        out_specs=pl.BlockSpec((None, cout, thw2), lambda i, j: (i, 0, j)),
        out_shape=jax.ShapeDtypeStruct((n, cout, hw_p), jnp.float32),
        compiler_params=pltpu.CompilerParams(
            dimension_semantics=("parallel", "parallel"),
            vmem_limit_bytes=_VMEM_LIMIT),
    )(x3d, w_eff, b_eff)

    if hw_p != hw:
        out3d = out3d[:, :, :hw]
    return out3d.reshape(n, cout, h, w)


def _reference(x_nchw, conv_w, conv_b, bn_gamma, bn_beta):
    # Pure-JAX reference (PyTorch training-mode BN semantics: biased batch variance).
    n, cin, h, w = x_nchw.shape
    cout = conv_w.shape[0]
    x2d = jnp.transpose(x_nchw, (0, 2, 3, 1)).reshape(-1, cin)
    y = x2d @ conv_w.T + conv_b
    mean = jnp.mean(y, axis=0, keepdims=True)
    var = jnp.mean((y - mean) ** 2, axis=0, keepdims=True)
    y = (y - mean) / jnp.sqrt(var + BN_EPS) * bn_gamma + bn_beta
    y = jnp.maximum(y, 0.0)
    return jnp.transpose(y.reshape(n, h, w, cout), (0, 3, 1, 2))


if __name__ == "__main__":
    key = jax.random.PRNGKey(0)
    k_x, k_w, k_b, k_g, k_be = jax.random.split(key, 5)

    N, CIN, H, W = 2, 4, 16, 16
    COUT = 8

    x = jax.random.normal(k_x, (N, CIN, H, W), dtype=jnp.float32)
    conv_w = jax.random.normal(k_w, (COUT, CIN), dtype=jnp.float32) * (1.0 / jnp.sqrt(CIN))
    conv_b = jax.random.normal(k_b, (COUT,), dtype=jnp.float32) * 0.1
    bn_gamma = 1.0 + 0.1 * jax.random.normal(k_g, (COUT,), dtype=jnp.float32)
    bn_beta = 0.1 * jax.random.normal(k_be, (COUT,), dtype=jnp.float32)

    ref = _reference(x, conv_w, conv_b, bn_gamma, bn_beta)

    # Default (bf16 MXU streams, f32 accumulation): loose tolerance from bf16 rounding.
    out_bf16 = cna1x1(x, conv_w, conv_b, bn_gamma, bn_beta)
    jax.block_until_ready(out_bf16)
    assert out_bf16.shape == (N, COUT, H, W)
    assert out_bf16.dtype == jnp.float32
    assert jnp.allclose(out_bf16, ref, atol=2e-2, rtol=2e-2), "bf16-path mismatch vs reference"

    # Full-f32 path: tight tolerance (matches the original PyTorch-equivalent numerics).
    out_f32 = cna1x1(x, conv_w, conv_b, bn_gamma, bn_beta, compute_dtype=jnp.float32)
    jax.block_until_ready(out_f32)
    assert jnp.allclose(out_f32, ref, atol=1e-4, rtol=1e-4), "f32-path mismatch vs reference"

    print("KERNEL_OK")
</pallas_src>

<mosaic_0001>
module attributes {stable_mosaic.version = 11 : i64} {
  func.func @_apply_kernel(%arg0: i32, %arg1: i32, %arg2: memref<1x4x256xbf16, #tpu.memory_space<vmem>>, %arg3: memref<8x4xbf16, #tpu.memory_space<vmem>>, %arg4: memref<8x1xf32, #tpu.memory_space<vmem>>, %arg5: memref<1x8x256xf32, #tpu.memory_space<vmem>>) attributes {dimension_semantics = [#tpu.dimension_semantics<parallel>, #tpu.dimension_semantics<parallel>], iteration_bounds = array<i64: 2, 1>, scalar_prefetch = 0 : i64, scratch_operands = 0 : i64, tpu.core_type = #tpu.core_type<tc>, window_params = [{transform_indices = @transform_0, window_bounds = array<i64: 1, 4, 256>}, {pipeline_mode = #tpu.pipeline_mode<synchronous>, transform_indices = @transform_1, window_bounds = array<i64: 8, 4>}, {pipeline_mode = #tpu.pipeline_mode<synchronous>, transform_indices = @transform_2, window_bounds = array<i64: 8, 1>}, {transform_indices = @transform_3, window_bounds = array<i64: 1, 8, 256>}]} {
    %c0 = arith.constant 0 : index
    %c0_0 = arith.constant 0 : index
    %0 = vector.load %arg3[%c0, %c0_0] : memref<8x4xbf16, #tpu.memory_space<vmem>>, vector<8x4xbf16>
    %c0_1 = arith.constant 0 : index
    %c0_2 = arith.constant 0 : index
    %c0_3 = arith.constant 0 : index
    %1 = vector.load %arg2[%c0_1, %c0_2, %c0_3] : memref<1x4x256xbf16, #tpu.memory_space<vmem>>, vector<1x4x256xbf16>
    %2 = vector.shape_cast %1 : vector<1x4x256xbf16> to vector<4x256xbf16>
    %cst = arith.constant dense<0.000000e+00> : vector<8x256xf32>
    %3 = tpu.matmul %0, %2, %cst {dimension_numbers = #tpu.dot_dimension_numbers<[1], [0], [0], [1], [0, 0, 1, 1], [], []>} : vector<8x4xbf16>, vector<4x256xbf16>, vector<8x256xf32> -> vector<8x256xf32>
    %c0_4 = arith.constant 0 : index
    %c0_5 = arith.constant 0 : index
    %4 = vector.load %arg4[%c0_4, %c0_5] : memref<8x1xf32, #tpu.memory_space<vmem>>, vector<8x1xf32>
    %5 = vector.broadcast %4 : vector<8x1xf32> to vector<8x256xf32>
    %6 = arith.addf %3, %5 : vector<8x256xf32>
    %cst_6 = arith.constant 0.000000e+00 : f32
    %7 = vector.broadcast %cst_6 : f32 to vector<8x256xf32>
    %8 = arith.maximumf %6, %7 : vector<8x256xf32>
    %c0_7 = arith.constant 0 : index
    %c0_8 = arith.constant 0 : index
    %c0_9 = arith.constant 0 : index
    %9 = vector.load %arg5[%c0_7, %c0_8, %c0_9] : memref<1x8x256xf32, #tpu.memory_space<vmem>>, vector<1x8x256xf32>
    %10 = vector.shape_cast %9 : vector<1x8x256xf32> to vector<8x256xf32>
    %11 = vector.shape_cast %8 : vector<8x256xf32> to vector<1x8x256xf32>
    tpu.vector_store %arg5[%c0_7, %c0_8, %c0_9], %11 {strides = array<i32>} : memref<1x8x256xf32, #tpu.memory_space<vmem>>, vector<1x8x256xf32>,
    return
  }
  func.func @transform_0(%arg0: i32, %arg1: i32) -> (i32, i32, i32) {
    %c0_i32 = arith.constant 0 : i32
    %c0_i32_0 = arith.constant 0 : i32
    return %arg0, %c0_i32, %arg1 : i32, i32, i32
  }
  func.func @transform_1(%arg0: i32, %arg1: i32) -> (i32, i32) {
    %c0_i32 = arith.constant 0 : i32
    %c0_i32_0 = arith.constant 0 : i32
    %c0_i32_1 = arith.constant 0 : i32
    return %c0_i32, %c0_i32_0 : i32, i32
  }
  func.func @transform_2(%arg0: i32, %arg1: i32) -> (i32, i32) {
    %c0_i32 = arith.constant 0 : i32
    %c0_i32_0 = arith.constant 0 : i32
    %c0_i32_1 = arith.constant 0 : i32
    return %c0_i32, %c0_i32_0 : i32, i32
  }
  func.func @transform_3(%arg0: i32, %arg1: i32) -> (i32, i32, i32) {
    %c0_i32 = arith.constant 0 : i32
    %c0_i32_0 = arith.constant 0 : i32
    return %arg0, %c0_i32, %arg1 : i32, i32, i32
  }
}

module attributes {stable_mosaic.version = 11 : i64} {
  func.func @_stats_kernel(%arg0: i32, %arg1: i32, %arg2: memref<1x4x256xbf16, #tpu.memory_space<vmem>>, %arg3: memref<8x4xbf16, #tpu.memory_space<vmem>>, %arg4: memref<1x8x1xf32, #tpu.memory_space<vmem>>, %arg5: memref<1x8x1xf32, #tpu.memory_space<vmem>>) attributes {dimension_semantics = [#tpu.dimension_semantics<parallel>, #tpu.dimension_semantics<arbitrary>], iteration_bounds = array<i64: 2, 1>, scalar_prefetch = 0 : i64, scratch_operands = 0 : i64, tpu.core_type = #tpu.core_type<tc>, window_params = [{transform_indices = @transform_0, window_bounds = array<i64: 1, 4, 256>}, {pipeline_mode = #tpu.pipeline_mode<synchronous>, transform_indices = @transform_1, window_bounds = array<i64: 8, 4>}, {transform_indices = @transform_2, window_bounds = array<i64: 1, 8, 1>}, {transform_indices = @transform_3, window_bounds = array<i64: 1, 8, 1>}]} {
    %c0_i32 = arith.constant 0 : i32
    %0 = arith.cmpi eq, %arg1, %c0_i32 : i32
    %1 = arith.extui %0 : i1 to i32
    %c0_i32_0 = arith.constant 0 : i32
    %2 = arith.cmpi ne, %1, %c0_i32_0 : i32
    scf.if %2 {
      %cst_19 = arith.constant 0.000000e+00 : f32
      %24 = vector.broadcast %cst_19 : f32 to vector<8x1xf32>
      %c0_20 = arith.constant 0 : index
      %c0_21 = arith.constant 0 : index
      %c0_22 = arith.constant 0 : index
      %25 = vector.load %arg4[%c0_20, %c0_21, %c0_22] : memref<1x8x1xf32, #tpu.memory_space<vmem>>, vector<1x8x1xf32>
      %26 = vector.shape_cast %25 : vector<1x8x1xf32> to vector<8x1xf32>
      %27 = vector.shape_cast %24 : vector<8x1xf32> to vector<1x8x1xf32>
      tpu.vector_store %arg4[%c0_20, %c0_21, %c0_22], %27 {strides = array<i32>} : memref<1x8x1xf32, #tpu.memory_space<vmem>>, vector<1x8x1xf32>,
      %cst_23 = arith.constant 0.000000e+00 : f32
      %28 = vector.broadcast %cst_23 : f32 to vector<8x1xf32>
      %c0_24 = arith.constant 0 : index
      %c0_25 = arith.constant 0 : index
      %c0_26 = arith.constant 0 : index
      %29 = vector.load %arg5[%c0_24, %c0_25, %c0_26] : memref<1x8x1xf32, #tpu.memory_space<vmem>>, vector<1x8x1xf32>
      %30 = vector.shape_cast %29 : vector<1x8x1xf32> to vector<8x1xf32>
      %31 = vector.shape_cast %28 : vector<8x1xf32> to vector<1x8x1xf32>
      tpu.vector_store %arg5[%c0_24, %c0_25, %c0_26], %31 {strides = array<i32>} : memref<1x8x1xf32, #tpu.memory_space<vmem>>, vector<1x8x1xf32>,
    } else {
    }
    %c0 = arith.constant 0 : index
    %c0_1 = arith.constant 0 : index
    %3 = vector.load %arg3[%c0, %c0_1] : memref<8x4xbf16, #tpu.memory_space<vmem>>, vector<8x4xbf16>
    %c0_2 = arith.constant 0 : index
    %c0_3 = arith.constant 0 : index
    %c0_4 = arith.constant 0 : index
    %4 = vector.load %arg2[%c0_2, %c0_3, %c0_4] : memref<1x4x256xbf16, #tpu.memory_space<vmem>>, vector<1x4x256xbf16>
    %5 = vector.shape_cast %4 : vector<1x4x256xbf16> to vector<4x256xbf16>
    %cst = arith.constant dense<0.000000e+00> : vector<8x256xf32>
    %6 = tpu.matmul %3, %5, %cst {dimension_numbers = #tpu.dot_dimension_numbers<[1], [0], [0], [1], [0, 0, 1, 1], [], []>} : vector<8x4xbf16>, vector<4x256xbf16>, vector<8x256xf32> -> vector<8x256xf32>
    %c0_5 = arith.constant 0 : index
    %c0_6 = arith.constant 0 : index
    %c0_7 = arith.constant 0 : index
    %7 = vector.load %arg4[%c0_5, %c0_6, %c0_7] : memref<1x8x1xf32, #tpu.memory_space<vmem>>, vector<1x8x1xf32>
    %8 = vector.shape_cast %7 : vector<1x8x1xf32> to vector<8x1xf32>
    %cst_8 = arith.constant dense<0.000000e+00> : vector<8xf32>
    %9 = vector.multi_reduction <add>, %6, %cst_8 [1] : vector<8x256xf32> to vector<8xf32>
    %10 = vector.shape_cast %9 : vector<8xf32> to vector<8x1xf32>
    %11 = arith.addf %8, %10 : vector<8x1xf32>
    %c0_9 = arith.constant 0 : index
    %c0_10 = arith.constant 0 : index
    %c0_11 = arith.constant 0 : index
    %12 = vector.load %arg4[%c0_9, %c0_10, %c0_11] : memref<1x8x1xf32, #tpu.memory_space<vmem>>, vector<1x8x1xf32>
    %13 = vector.shape_cast %12 : vector<1x8x1xf32> to vector<8x1xf32>
    %14 = vector.shape_cast %11 : vector<8x1xf32> to vector<1x8x1xf32>
    tpu.vector_store %arg4[%c0_9, %c0_10, %c0_11], %14 {strides = array<i32>} : memref<1x8x1xf32, #tpu.memory_space<vmem>>, vector<1x8x1xf32>,
    %c0_12 = arith.constant 0 : index
    %c0_13 = arith.constant 0 : index
    %c0_14 = arith.constant 0 : index
    %15 = vector.load %arg5[%c0_12, %c0_13, %c0_14] : memref<1x8x1xf32, #tpu.memory_space<vmem>>, vector<1x8x1xf32>
    %16 = vector.shape_cast %15 : vector<1x8x1xf32> to vector<8x1xf32>
    %17 = arith.mulf %6, %6 : vector<8x256xf32>
    %cst_15 = arith.constant dense<0.000000e+00> : vector<8xf32>
    %18 = vector.multi_reduction <add>, %17, %cst_15 [1] : vector<8x256xf32> to vector<8xf32>
    %19 = vector.shape_cast %18 : vector<8xf32> to vector<8x1xf32>
    %20 = arith.addf %16, %19 : vector<8x1xf32>
    %c0_16 = arith.constant 0 : index
    %c0_17 = arith.constant 0 : index
    %c0_18 = arith.constant 0 : index
    %21 = vector.load %arg5[%c0_16, %c0_17, %c0_18] : memref<1x8x1xf32, #tpu.memory_space<vmem>>, vector<1x8x1xf32>
    %22 = vector.shape_cast %21 : vector<1x8x1xf32> to vector<8x1xf32>
    %23 = vector.shape_cast %20 : vector<8x1xf32> to vector<1x8x1xf32>
    tpu.vector_store %arg5[%c0_16, %c0_17, %c0_18], %23 {strides = array<i32>} : memref<1x8x1xf32, #tpu.memory_space<vmem>>, vector<1x8x1xf32>,
    return
  }
  func.func @transform_0(%arg0: i32, %arg1: i32) -> (i32, i32, i32) {
    %c0_i32 = arith.constant 0 : i32
    %c0_i32_0 = arith.constant 0 : i32
    return %arg0, %c0_i32, %arg1 : i32, i32, i32
  }
  func.func @transform_1(%arg0: i32, %arg1: i32) -> (i32, i32) {
    %c0_i32 = arith.constant 0 : i32
    %c0_i32_0 = arith.constant 0 : i32
    %c0_i32_1 = arith.constant 0 : i32
    return %c0_i32, %c0_i32_0 : i32, i32
  }
  func.func @transform_2(%arg0: i32, %arg1: i32) -> (i32, i32, i32) {
    %c0_i32 = arith.constant 0 : i32
    %c0_i32_0 = arith.constant 0 : i32
    %c0_i32_1 = arith.constant 0 : i32
    return %arg0, %c0_i32, %c0_i32_0 : i32, i32, i32
  }
  func.func @transform_3(%arg0: i32, %arg1: i32) -> (i32, i32, i32) {
    %c0_i32 = arith.constant 0 : i32
    %c0_i32_0 = arith.constant 0 : i32
    %c0_i32_1 = arith.constant 0 : i32
    return %arg0, %c0_i32, %c0_i32_0 : i32, i32, i32
  }
}

</mosaic_0001>

<bundles_post_ra>
// kernel: cna1x1.3
= control target key start
LH: loop header
LB: loop body
LE: loop exit
PB: predicated region body
PF: predicated region fallthrough
CT: control target
= control target key end

     0   :  { %s458_s12 = smov 0   ;;  %s460_s13 = smov 0   ;;  %s497_s0 = inlined_call_operand.vmem [shape: bf16[2,4,256], index: 0, kind: input, shape index: {}]   ;;  %s498_s1 = inlined_call_operand.vmem [shape: bf16[8,4], index: 1, kind: input, shape index: {}]   ;;  %s499_s2 = inlined_call_operand.vmem [shape: f32[8,1], index: 2, kind: input, shape index: {}]   ;;  %s500_s3 = inlined_call_operand.vmem [shape: f32[2,8,256], index: 3, kind: output, shape index: {}]  }
   0x1   :  { %s462_s14 = smov 0  }
   0x2 LB: > { %s25_s15 = sadd.s32 1, %s431_s13  ;;  %p375_p0 = scmp.ge.s32.totalorder %s435_s14, 1  ;;  %s435_s14 = sphi %s462_s14, %s13_s14   ;;  %s431_s13 = sphi %s460_s13, %s502_s13   ;;  %s427_s12 = sphi %s458_s12, %s501_s12  }
   0x3   : > { %p27_p1 = scmp.ge.s32.totalorder %s25_s15, 2  ;;  %p158_p2 = scmp.lt.s32.totalorder %s435_s14, 3 }
   0x5   : > { %s504_s15 = smov (%p27_p1, %s25_s15), 0  ;;  %p159_p3 = pnand %p375_p0, %p158_p2 }
   0x6   : > { %p191_p4 = scmp.lt.s32.totalorder (!%p159_p3), %s427_s12, 1 }
   0x7   : > { %162 = sbr.rel (%p159_p3) target bundleno = 222 (0xde), region = 32 }
   0xc   : > { %v437_v0 = vmov 0   ;;  %v213_v1 = vld [vmem:[%s499_s2] sm:$0xff]  ;;  %s506_s12 = smov (!%p191_p4, %s427_s12), 1  ;;  %vm232_vm0 = vcmask 1041408   ;;  %vm228_vm1 = vcmask 31744  }
   0xd   : > { %271 = vmatprep.mubr.bf16.mxu0 %v437_v0  ;;  %412 = vset.pattern.permute.xlu0 %v437_v0  ;;  %s385_s18 = sshll.u32 %s506_s12, 2  ;;  %v211_v5 = vld [vmem:[%s498_s1] sm:$0xf]  ;;  %s386_s24 = sshll.u32 %s506_s12, 4 }
   0xe   : > { %216 = vperm.xlu0 %412, %v213_v1   ;;  %s198_s21 = scalar_lea.vmem %s497_s0, %s385_s18  ;;  %s208_s27 = scalar_lea.vmem %s500_s3, %s386_s24 }
   0xf   : > { %v380_v2 = vld.sshfl [vmem:[%s198_s21] sm:$0x33 pattern:$0x76325410] }
  0x10   : > { %v227_v3 = vcombine.high %v380_v2, %v380_v2  ;;  %v234_v4 = vsel %vm232_vm0, %v380_v2, 0 }
  0x12   : > { %381 = vmatprep.subr.msk.bf16.mxu0 %vm232_vm0, %v227_v3 }
  0x13   : > { %254 = vmatpush1.bf16.msra.mxu0 %v234_v4 }
  0x16   : > { %382 = vmatmul.mubr.msk.bf16.vlgmr.msra.gmra.mxu0 %vm228_vm1, %v211_v5 }
  0x89   : > { %v217_v6 = vpop.permute.xlu0 %216 }
  0xd6   : > { %v273_v7 = vpop.f32.mrf.mxu0 }
  0xd7   : > { %v274_v8 = vadd.f32 %v273_v7, %v217_v6 }
  0xd8   : > { %v275_v9 = vpop.f32.mrf.mxu0 }
  0xd9   : > { %v280_v10 = vmax.f32 %v274_v8, 0.0  ;;  %v276_v11 = vadd.f32 %v275_v9, %v217_v6 }
  0xda   : > { %v277_v12 = vpop.f32.mrf.mxu0 }
  0xdb   : > { %282 = vst [vmem:[%s208_s27] sm:$0xff] %v280_v10  ;;  %v281_v13 = vmax.f32 %v276_v11, 0.0 }
  0xdc   : > { %v278_v14 = vpop.f32.mrf.mxu0 }
  0xdd   : > { %283 = vst [vmem:[%s208_s27 + $0x8] sm:$0xff] %v281_v13 }
  0xde PF: > { %s13_s14 = sadd.s32 1, %s435_s14   ;;  %s501_s12 = smov %s431_s13 }
  0xdf   : > { %p10_p5 = scmp.ge.s32.totalorder %s13_s14, 4   ;;  %s502_s13 = smov %s504_s15 }
  0xe1   :  { %12 = sbr.rel (!%p10_p5) target bundleno = 2 (0x2), region = 62 }

// kernel: cna1x1.2
= control target key start
LH: loop header
LB: loop body
LE: loop exit
PB: predicated region body
PF: predicated region fallthrough
CT: control target
= control target key end

     0   :  { %s479_s12 = smov 0   ;;  %s481_s13 = smov 0   ;;  %s522_s0 = inlined_call_operand.vmem [shape: bf16[2,4,256], index: 0, kind: input, shape index: {}]   ;;  %s523_s1 = inlined_call_operand.vmem [shape: bf16[8,4], index: 1, kind: input, shape index: {}]   ;;  %s524_s2 = inlined_call_operand.vmem [shape: f32[2,8,1], index: 2, kind: output, shape index: {0}]   ;;  %s525_s3 = inlined_call_operand.vmem [shape: f32[2,8,1], index: 3, kind: output, shape index: {1}]  }
   0x1   :  { %s483_s14 = smov 0  }
   0x2 LB: > { %s26_s15 = sadd.s32 1, %s451_s13  ;;  %p396_p0 = scmp.ge.s32.totalorder %s455_s14, 1  ;;  %s455_s14 = sphi %s483_s14, %s14_s14   ;;  %s451_s13 = sphi %s481_s13, %s527_s13   ;;  %s447_s12 = sphi %s479_s12, %s526_s12  }
   0x3   : > { %p28_p1 = scmp.ge.s32.totalorder %s26_s15, 2  ;;  %p159_p2 = scmp.lt.s32.totalorder %s455_s14, 3 }
   0x5   : > { %s529_s15 = smov (%p28_p1, %s26_s15), 0  ;;  %p160_p3 = pnand %p396_p0, %p159_p2 }
   0x6   : > { %p191_p4 = scmp.lt.s32.totalorder (!%p160_p3), %s447_s12, 1 }
   0x7   : > { %163 = sbr.rel (%p160_p3) target bundleno = 364 (0x16c), region = 28 }
   0xc   : > { %v457_v0 = vmov 0   ;;  %s531_s12 = smov (!%p191_p4, %s447_s12), 1  ;;  %vm231_vm0 = vcmask 1041408   ;;  %v216_v4 = vld [vmem:[%s523_s1] sm:$0xf]  ;;  %vm227_vm1 = vcmask 31744  }
   0xd   : > { %270 = vmatprep.mubr.bf16.mxu0 %v457_v0  ;;  %s406_s16 = sshll.u32 %s531_s12, 2  ;;  %s399_s22 = sshll.u32 %s531_s12, 3  ;;  %vm213_vm2 = vcmask 7168   ;;  %v458_v5 = vmov 0.0  }
   0xe   : > { %s198_s19 = scalar_lea.vmem %s522_s0, %s406_s16  ;;  %s203_s25 = scalar_lea.vmem %s524_s2, %s399_s22 }
   0xf   : > { %v401_v1 = vld.sshfl [vmem:[%s198_s19] sm:$0x33 pattern:$0x76325410]  ;;  %214 = vst.msk [vmem:[%s203_s25] sm:$0xff] %vm213_vm2, %v458_v5  ;;  %s207_s28 = scalar_lea.vmem %s525_s3, %s399_s22 }
  0x10   : > { %v226_v2 = vcombine.high %v401_v1, %v401_v1  ;;  %v233_v3 = vsel %vm231_vm0, %v401_v1, 0  ;;  %215 = vst.msk [vmem:[%s207_s28] sm:$0xff] %vm213_vm2, %v458_v5 }
  0x12   : > { %402 = vmatprep.subr.msk.bf16.mxu0 %vm231_vm0, %v226_v2 }
  0x13   : > { %253 = vmatpush1.bf16.msra.mxu0 %v233_v3 }
  0x16   : > { %403 = vmatmul.mubr.msk.bf16.vlgmr.msra.gmra.mxu0 %vm227_vm1, %v216_v4  ;;  %v279_v14 = vld [vmem:[%s203_s25] sm:$0xff] }
  0x17   : > { %v286_v17 = vld [vmem:[%s207_s28] sm:$0xff] }
  0xd6   : > { %v272_v6 = vpop.f32.mrf.mxu0 }
  0xd7   : > { %v287_v11 = vmul.f32 %v272_v6, %v272_v6 }
  0xd8   : > { %v274_v7 = vpop.f32.mrf.mxu0 }
  0xd9   : > { %v288_v8 = vmul.f32 %v274_v7, %v274_v7  ;;  %v280_v9 = vadd.f32 %v274_v7, %v272_v6 }
  0xda   : > { %v276_v10 = vpop.f32.mrf.mxu0 }
  0xdb   : > { %281 = vadd.xlane.f32.xlu0 %v280_v9  ;;  %v289_v13 = vadd.f32 %v288_v8, %v287_v11 }
  0xdc   : > { %v277_v12 = vpop.f32.mrf.mxu0 }
  0xdf   : > { %290 = vadd.xlane.f32.xlu0 %v289_v13 }
 0x164   : > { %v282_v15 = vpop.xlane.xlu0 %281 }
 0x165   : > { %v283_v16 = vadd.f32 %v282_v15, %v279_v14 }
 0x167   : > { %285 = vst.msk [vmem:[%s203_s25] sm:$0xff] %vm213_vm2, %v283_v16 }
 0x168   : > { %v291_v18 = vpop.xlane.xlu0 %290 }
 0x169   : > { %v292_v19 = vadd.f32 %v291_v18, %v286_v17 }
 0x16b   : > { %293 = vst.msk [vmem:[%s207_s28] sm:$0xff] %vm213_vm2, %v292_v19 }
 0x16c PF: > { %s14_s14 = sadd.s32 1, %s455_s14   ;;  %s526_s12 = smov %s451_s13 }
 0x16d   : > { %p11_p5 = scmp.ge.s32.totalorder %s14_s14, 4   ;;  %s527_s13 = smov %s529_s15 }
 0x16f   :  { %13 = sbr.rel (!%p11_p5) target bundleno = 2 (0x2), region = 74 }

</bundles_post_ra>
